<compile_context>
chip_gen: v6e
topology: v6e:2x2x1
jax: 0.10.0
libtpu: 0.0.40
codegen_flags: <defaults>
</compile_context>

<pallas_src>
import functools
import math

import jax
import jax.numpy as jnp
from jax import lax
from jax.experimental import pallas as pl
from jax.experimental.pallas import tpu as pltpu


_INV_SQRT2 = 1.0 / math.sqrt(2.0)


def _round_up(x, m):
    return ((x + m - 1) // m) * m


def _gelu_f32(x, approximate):
    if approximate:
        # tanh approximation: routes through the EUP slot (free while the MXU
        # is the binding unit); small accuracy delta vs torch's exact GELU.
        return jax.nn.gelu(x, approximate=True)
    # PyTorch nn.GELU() default: 0.5 * x * (1 + erf(x / sqrt(2)))
    return 0.5 * x * (1.0 + lax.erf(x * _INV_SQRT2))


def _mlp_kernel(x_ref, w_fc_ref, b_fc_ref, w_proj_ref, b_proj_ref, o_ref,
                acc_ref, *, approx_gelu):
    """One (row-tile, hidden-tile) grid step.

    The hidden axis is the reduction axis of the second matmul, so partial
    products are accumulated in acc_ref (f32 VMEM) and the output tile is only
    written on the last hidden step.
    """
    j = pl.program_id(1)

    @pl.when(j == 0)
    def _init():
        acc_ref[...] = jnp.zeros_like(acc_ref)

    # c_fc slice: (TB, Dp) @ (Dp, TH) -> (TB, TH), f32 MXU accumulation.
    h = jnp.dot(x_ref[...], w_fc_ref[...],
                preferred_element_type=jnp.float32) + b_fc_ref[...]
    h = _gelu_f32(h, approx_gelu)                       # f32 on the VPU / EUP
    # c_proj partial: (TB, TH) @ (TH, Dp), accumulated in the f32 VMEM scratch.
    acc_ref[...] += jnp.dot(h.astype(w_proj_ref.dtype), w_proj_ref[...],
                            preferred_element_type=jnp.float32)

    @pl.when(j == pl.num_programs(1) - 1)
    def _finalize():
        # dropout(p=0.0) == identity.
        o_ref[...] = (acc_ref[...] + b_proj_ref[...]).astype(o_ref.dtype)


def prepare_mlp_params(params, *, compute_dtype=jnp.bfloat16):
    """Pad feature dims to multiples of 128 (lane-dense) and cast weights to the
    MXU compute dtype ONCE, outside the per-call path.

    params:
        w_fc  : (n_embd, 4*n_embd)   (fan_in, fan_out layout)
        b_fc  : (1, 4*n_embd)
        w_proj: (4*n_embd, n_embd)
        b_proj: (1, n_embd)
    """
    cdt = jnp.dtype(compute_dtype)
    D, H = params["w_fc"].shape
    assert params["w_proj"].shape == (H, D)
    Dp, Hp = _round_up(D, 128), _round_up(H, 128)

    def pad2(a, s0, s1, dtype):
        a = a.astype(dtype)
        if a.shape == (s0, s1):
            return a
        return jnp.zeros((s0, s1), dtype).at[:a.shape[0], :a.shape[1]].set(a)

    return {
        # Weights in the compute dtype (bf16 default: MXU-native, halves DMA
        # and VMEM residency).  Biases stay f32 (added after f32 accumulation).
        "w_fc": pad2(params["w_fc"], Dp, Hp, cdt),
        "w_proj": pad2(params["w_proj"], Hp, Dp, cdt),
        "b_fc": pad2(params["b_fc"], 1, Hp, jnp.float32),
        "b_proj": pad2(params["b_proj"], 1, Dp, jnp.float32),
        "D": D, "H": H, "Dp": Dp, "Hp": Hp, "dtype": cdt,
    }


def _vmem_capacity_bytes():
    try:
        return int(pltpu.get_tpu_info().vmem_capacity_bytes)
    except Exception:
        return 64 << 20            # conservative: v7x per-TensorCore VMEM


def _pick_hidden_tile(Hp, block_h):
    th = min(_round_up(max(block_h, 128), 128), Hp)
    while Hp % th:                 # Hp is a multiple of 128 -> terminates at 128
        th -= 128
    return th


def mlp_forward(x, prepared, *, dropout_p=0.0, block_m=None, block_h=512,
                out_dtype=jnp.float32, approx_gelu=False, force_stream=None):
    """Fused MLP forward: y = dropout(c_proj(gelu(c_fc(x)))), dropout_p == 0.

    x: (..., n_embd) float32 (cast to the prepared compute dtype internally).
    prepared: output of prepare_mlp_params() (padding/casting hoisted there).
    """
    if dropout_p != 0.0:
        # TODO(synk): training-mode stochastic dropout (pltpu.prng_seed /
        # prng_random_bits in the finalize step) not implemented; p=0.0 / eval
        # mode is the identity and is what the reference exercises.
        raise NotImplementedError("dropout_p > 0 not supported in this kernel")

    D, Dp, Hp = prepared["D"], prepared["Dp"], prepared["Hp"]
    cdt = prepared["dtype"]
    w_fc, b_fc = prepared["w_fc"], prepared["b_fc"]
    w_proj, b_proj = prepared["w_proj"], prepared["b_proj"]

    orig_shape = x.shape
    assert orig_shape[-1] == D
    x2 = x.reshape(-1, D)
    M = x2.shape[0]

    odt = jnp.dtype(out_dtype)
    vmem_cap = _vmem_capacity_bytes()
    budget = vmem_cap - (8 << 20)

    # Row tiling: balanced tiles (multiple of 8) so padding waste is bounded by
    # ~8 rows per tile rather than up to block_m-8.  block_m defaults to 512 on
    # 128 MiB-VMEM parts (v5e/v6e) and 256 on v7x (64 MiB); keep it a multiple
    # of 128 for peak MXU utilisation (it is by default).
    if block_m is None:
        block_m = 512 if vmem_cap >= (96 << 20) else 256
    block_m = max(_round_up(block_m, 8), 8)
    M8 = _round_up(M, 8)
    grid_m = pl.cdiv(M8, block_m)
    TB = _round_up(pl.cdiv(M8, grid_m), 8)
    Mp = grid_m * TB

    def footprint(th, w_bufs):
        w = w_bufs * 2 * Dp * th * cdt.itemsize            # w_fc + w_proj blocks
        b = w_bufs * th * 4 + Dp * 4                       # biases (f32)
        io = 2 * TB * Dp * (cdt.itemsize + odt.itemsize)   # double-buffered x/y
        return w + b + io + TB * Dp * 4                    # + f32 accumulator

    # Hidden-dim tiling: keep the full padded weights VMEM-resident when they
    # fit; otherwise stream them in (Dp, TH)/(TH, Dp) blocks over a second grid
    # axis (needed for GPT-2-medium+ hidden sizes on v7x's 64 MiB VMEM).
    if force_stream is None:
        stream = footprint(Hp, 1) > budget
    else:
        stream = bool(force_stream)
    if stream:
        TH = _pick_hidden_tile(Hp, block_h)
        grid_h = Hp // TH
    else:
        TH, grid_h = Hp, 1

    fp = footprint(TH, 1 if grid_h == 1 else 2)
    vmem_limit = int(1.3 * fp) + (2 << 20)
    vmem_limit = min(max(vmem_limit, 32 << 20),
                     max(budget, fp + (2 << 20)),
                     128 << 20)

    # x tile: pad rows to Mp and lanes to Dp only when needed (cast once).
    if Mp == M and Dp == D:
        xp = x2.astype(cdt)
    else:
        # NOTE: padded *rows* compute gelu(b_fc) @ w_proj + b_proj (nonzero
        # garbage) and are sliced off below; padded *lanes* are exactly zero.
        xp = jnp.zeros((Mp, Dp), cdt).at[:M, :D].set(x2.astype(cdt))

    kernel = functools.partial(_mlp_kernel, approx_gelu=approx_gelu)

    cost = pl.CostEstimate(
        flops=4 * Mp * Dp * Hp,                 # two matmuls, 2 flops / MAC
        transcendentals=Mp * Hp,                # one erf/tanh per hidden elem
        bytes_accessed=(Mp * Dp * cdt.itemsize                               # x
                        + 2 * Dp * Hp * cdt.itemsize * (grid_m if stream else 1)
                        + (Hp + Dp) * 4                                  # biases
                        + Mp * Dp * odt.itemsize),                       # y
    )

    def build_and_run(single_buffer_weights):
        wkw = ({"pipeline_mode": pl.Buffered(1)}
               if single_buffer_weights else {})
        in_specs = [
            pl.BlockSpec((TB, Dp), lambda i, j: (i, 0)),          # x (pipelined)
            pl.BlockSpec((Dp, TH), lambda i, j: (0, j), **wkw),   # w_fc
            pl.BlockSpec((1, TH), lambda i, j: (0, j), **wkw),    # b_fc
            pl.BlockSpec((TH, Dp), lambda i, j: (j, 0), **wkw),   # w_proj
            pl.BlockSpec((1, Dp), lambda i, j: (0, 0), **wkw),    # b_proj
        ]
        return pl.pallas_call(
            kernel,
            out_shape=jax.ShapeDtypeStruct((Mp, Dp), odt),
            grid=(grid_m, grid_h),
            in_specs=in_specs,
            out_specs=pl.BlockSpec((TB, Dp), lambda i, j: (i, 0)),
            scratch_shapes=[pltpu.VMEM((TB, Dp), jnp.float32)],
            compiler_params=pltpu.CompilerParams(
                dimension_semantics=("parallel", "arbitrary"),
                vmem_limit_bytes=int(vmem_limit),
            ),
            cost_estimate=cost,
        )(xp, w_fc, b_fc, w_proj, b_proj)

    if grid_h == 1:
        # Weight blocks have a constant index -> single-buffer them to halve
        # their VMEM residency.  Fall back to default double buffering if this
        # jax build does not honour pipeline_mode on pallas_call BlockSpecs.
        try:
            out_padded = build_and_run(True)
        except Exception:
            out_padded = build_and_run(False)
    else:
        out_padded = build_and_run(False)

    y = out_padded[:M, :D]
    return y.reshape(orig_shape[:-1] + (D,))


def init_mlp_params(key, n_embd):
    """torch.nn.Linear-style init: U(-1/sqrt(fan_in), 1/sqrt(fan_in)).

    Weights stored (fan_in, fan_out), i.e. transposed vs torch's (out, in).
    """
    dims = {"fc": (n_embd, 4 * n_embd), "proj": (4 * n_embd, n_embd)}
    params = {}
    for name, (fan_in, fan_out) in dims.items():
        key, kw, kb = jax.random.split(key, 3)
        bound = 1.0 / math.sqrt(fan_in)
        params[f"w_{name}"] = jax.random.uniform(
            kw, (fan_in, fan_out), jnp.float32, -bound, bound)
        params[f"b_{name}"] = jax.random.uniform(
            kb, (1, fan_out), jnp.float32, -bound, bound)
    return params


def _reference_forward(x, params):
    h = jax.nn.gelu(x @ params["w_fc"] + params["b_fc"], approximate=False)
    return h @ params["w_proj"] + params["b_proj"]   # dropout(p=0) == identity


if __name__ == "__main__":
    key = jax.random.PRNGKey(0)
    k_params, k_x, k_params2, k_x2 = jax.random.split(key, 4)

    # Primary config: batch=2, seq=8, n_embd=32 (hidden 4*32 = 128).
    B, T, n_embd = 2, 8, 32
    params = init_mlp_params(k_params, n_embd)
    x = jax.random.normal(k_x, (B, T, n_embd), jnp.float32)
    y_ref = _reference_forward(x, params)

    # 1) Default bf16 fast path: bf16 MXU operands, f32 accumulation.
    prep_bf16 = prepare_mlp_params(params, compute_dtype=jnp.bfloat16)
    y_bf16 = jax.block_until_ready(mlp_forward(x, prep_bf16))
    assert y_bf16.shape == (B, T, n_embd)
    assert jnp.allclose(y_bf16, y_ref, atol=5e-2, rtol=5e-2)

    # 1b) tanh-approx GELU option (EUP path) on the same shapes.
    y_tanh = jax.block_until_ready(mlp_forward(x, prep_bf16, approx_gelu=True))
    assert jnp.allclose(y_tanh, y_ref, atol=5e-2, rtol=5e-2)

    # 2) f32 path for bit-close validation against the PyTorch-style reference.
    prep_f32 = prepare_mlp_params(params, compute_dtype=jnp.float32)
    y_f32 = jax.block_until_ready(mlp_forward(x, prep_f32))
    assert jnp.allclose(y_f32, y_ref, atol=1e-4, rtol=1e-4)

    # 3) Hidden-dim streaming path (weights streamed in 128-wide blocks,
    #    accumulated in the f32 VMEM scratch), exercised with grid_h=2.
    n_embd2 = 64
    params2 = init_mlp_params(k_params2, n_embd2)
    x2 = jax.random.normal(k_x2, (B, T, n_embd2), jnp.float32)
    prep2 = prepare_mlp_params(params2, compute_dtype=jnp.bfloat16)
    y2 = jax.block_until_ready(
        mlp_forward(x2, prep2, block_h=128, force_stream=True))
    y2_ref = _reference_forward(x2, params2)
    assert y2.shape == (B, T, n_embd2)
    assert jnp.allclose(y2, y2_ref, atol=5e-2, rtol=5e-2)

    print("KERNEL_OK")
</pallas_src>

<mosaic_0001>
module attributes {stable_mosaic.version = 11 : i64} {
  func.func @_mlp_kernel(%arg0: i32, %arg1: i32, %arg2: memref<16x128xbf16, #tpu.memory_space<vmem>>, %arg3: memref<128x128xbf16, #tpu.memory_space<vmem>>, %arg4: memref<1x128xf32, #tpu.memory_space<vmem>>, %arg5: memref<128x128xbf16, #tpu.memory_space<vmem>>, %arg6: memref<1x128xf32, #tpu.memory_space<vmem>>, %arg7: memref<16x128xf32, #tpu.memory_space<vmem>>, %arg8: memref<16x128xf32, #tpu.memory_space<vmem>>) attributes {dimension_semantics = [#tpu.dimension_semantics<parallel>, #tpu.dimension_semantics<arbitrary>], iteration_bounds = array<i64: 1, 1>, scalar_prefetch = 0 : i64, scratch_operands = 1 : i64, tpu.core_type = #tpu.core_type<tc>, window_params = [{transform_indices = @transform_0, window_bounds = array<i64: 16, 128>}, {pipeline_mode = #tpu.pipeline_mode<synchronous>, transform_indices = @transform_1, window_bounds = array<i64: 128, 128>}, {pipeline_mode = #tpu.pipeline_mode<synchronous>, transform_indices = @transform_2, window_bounds = array<i64: 1, 128>}, {pipeline_mode = #tpu.pipeline_mode<synchronous>, transform_indices = @transform_3, window_bounds = array<i64: 128, 128>}, {pipeline_mode = #tpu.pipeline_mode<synchronous>, transform_indices = @transform_4, window_bounds = array<i64: 1, 128>}, {transform_indices = @transform_5, window_bounds = array<i64: 16, 128>}]} {
    %c0_i32 = arith.constant 0 : i32
    %0 = arith.cmpi eq, %arg1, %c0_i32 : i32
    %1 = arith.extui %0 : i1 to i32
    %c0_i32_0 = arith.constant 0 : i32
    %2 = arith.cmpi ne, %1, %c0_i32_0 : i32
    scf.if %2 {
      %cst_18 = arith.constant 0.000000e+00 : f32
      %26 = vector.broadcast %cst_18 : f32 to vector<16x128xf32>
      %c0_19 = arith.constant 0 : index
      %c0_20 = arith.constant 0 : index
      %27 = vector.load %arg8[%c0_19, %c0_20] : memref<16x128xf32, #tpu.memory_space<vmem>>, vector<16x128xf32>
      tpu.vector_store %arg8[%c0_19, %c0_20], %26 {strides = array<i32>} : memref<16x128xf32, #tpu.memory_space<vmem>>, vector<16x128xf32>,
    } else {
    }
    %c0 = arith.constant 0 : index
    %c0_1 = arith.constant 0 : index
    %3 = vector.load %arg2[%c0, %c0_1] : memref<16x128xbf16, #tpu.memory_space<vmem>>, vector<16x128xbf16>
    %c0_2 = arith.constant 0 : index
    %c0_3 = arith.constant 0 : index
    %4 = vector.load %arg3[%c0_2, %c0_3] : memref<128x128xbf16, #tpu.memory_space<vmem>>, vector<128x128xbf16>
    %cst = arith.constant dense<0.000000e+00> : vector<16x128xf32>
    %5 = tpu.matmul %3, %4, %cst {dimension_numbers = #tpu.dot_dimension_numbers<[1], [0], [0], [1], [0, 0, 1, 1], [], []>} : vector<16x128xbf16>, vector<128x128xbf16>, vector<16x128xf32> -> vector<16x128xf32>
    %c0_4 = arith.constant 0 : index
    %c0_5 = arith.constant 0 : index
    %6 = vector.load %arg4[%c0_4, %c0_5] : memref<1x128xf32, #tpu.memory_space<vmem>>, vector<1x128xf32>
    %7 = vector.broadcast %6 : vector<1x128xf32> to vector<16x128xf32>
    %8 = arith.addf %5, %7 : vector<16x128xf32>
    %cst_6 = arith.constant 5.000000e-01 : f32
    %9 = vector.broadcast %cst_6 : f32 to vector<16x128xf32>
    %10 = arith.mulf %9, %8 : vector<16x128xf32>
    %cst_7 = arith.constant 0.707106769 : f32
    %11 = vector.broadcast %cst_7 : f32 to vector<16x128xf32>
    %12 = arith.mulf %8, %11 : vector<16x128xf32>
    %13 = math.erf %12 : vector<16x128xf32>
    %cst_8 = arith.constant 1.000000e+00 : f32
    %14 = vector.broadcast %cst_8 : f32 to vector<16x128xf32>
    %15 = arith.addf %14, %13 : vector<16x128xf32>
    %16 = arith.mulf %10, %15 : vector<16x128xf32>
    %c0_9 = arith.constant 0 : index
    %c0_10 = arith.constant 0 : index
    %17 = vector.load %arg8[%c0_9, %c0_10] : memref<16x128xf32, #tpu.memory_space<vmem>>, vector<16x128xf32>
    %18 = arith.truncf %16 : vector<16x128xf32> to vector<16x128xbf16>
    %c0_11 = arith.constant 0 : index
    %c0_12 = arith.constant 0 : index
    %19 = vector.load %arg5[%c0_11, %c0_12] : memref<128x128xbf16, #tpu.memory_space<vmem>>, vector<128x128xbf16>
    %cst_13 = arith.constant dense<0.000000e+00> : vector<16x128xf32>
    %20 = tpu.matmul %18, %19, %cst_13 {dimension_numbers = #tpu.dot_dimension_numbers<[1], [0], [0], [1], [0, 0, 1, 1], [], []>} : vector<16x128xbf16>, vector<128x128xbf16>, vector<16x128xf32> -> vector<16x128xf32>
    %21 = arith.addf %17, %20 : vector<16x128xf32>
    %c0_14 = arith.constant 0 : index
    %c0_15 = arith.constant 0 : index
    %22 = vector.load %arg8[%c0_14, %c0_15] : memref<16x128xf32, #tpu.memory_space<vmem>>, vector<16x128xf32>
    tpu.vector_store %arg8[%c0_14, %c0_15], %21 {strides = array<i32>} : memref<16x128xf32, #tpu.memory_space<vmem>>, vector<16x128xf32>,
    %c0_i32_16 = arith.constant 0 : i32
    %23 = arith.cmpi eq, %arg1, %c0_i32_16 : i32
    %24 = arith.extui %23 : i1 to i32
    %c0_i32_17 = arith.constant 0 : i32
    %25 = arith.cmpi ne, %24, %c0_i32_17 : i32
    scf.if %25 {
      %c0_18 = arith.constant 0 : index
      %c0_19 = arith.constant 0 : index
      %26 = vector.load %arg8[%c0_18, %c0_19] : memref<16x128xf32, #tpu.memory_space<vmem>>, vector<16x128xf32>
      %c0_20 = arith.constant 0 : index
      %c0_21 = arith.constant 0 : index
      %27 = vector.load %arg6[%c0_20, %c0_21] : memref<1x128xf32, #tpu.memory_space<vmem>>, vector<1x128xf32>
      %28 = vector.broadcast %27 : vector<1x128xf32> to vector<16x128xf32>
      %29 = arith.addf %26, %28 : vector<16x128xf32>
      %c0_22 = arith.constant 0 : index
      %c0_23 = arith.constant 0 : index
      %30 = vector.load %arg7[%c0_22, %c0_23] : memref<16x128xf32, #tpu.memory_space<vmem>>, vector<16x128xf32>
      tpu.vector_store %arg7[%c0_22, %c0_23], %29 {strides = array<i32>} : memref<16x128xf32, #tpu.memory_space<vmem>>, vector<16x128xf32>,
    } else {
    }
    return
  }
  func.func @transform_0(%arg0: i32, %arg1: i32) -> (i32, i32) {
    %c0_i32 = arith.constant 0 : i32
    %c0_i32_0 = arith.constant 0 : i32
    return %arg0, %c0_i32 : i32, i32
  }
  func.func @transform_1(%arg0: i32, %arg1: i32) -> (i32, i32) {
    %c0_i32 = arith.constant 0 : i32
    %c0_i32_0 = arith.constant 0 : i32
    return %c0_i32, %arg1 : i32, i32
  }
  func.func @transform_2(%arg0: i32, %arg1: i32) -> (i32, i32) {
    %c0_i32 = arith.constant 0 : i32
    %c0_i32_0 = arith.constant 0 : i32
    return %c0_i32, %arg1 : i32, i32
  }
  func.func @transform_3(%arg0: i32, %arg1: i32) -> (i32, i32) {
    %c0_i32 = arith.constant 0 : i32
    %c0_i32_0 = arith.constant 0 : i32
    return %arg1, %c0_i32 : i32, i32
  }
  func.func @transform_4(%arg0: i32, %arg1: i32) -> (i32, i32) {
    %c0_i32 = arith.constant 0 : i32
    %c0_i32_0 = arith.constant 0 : i32
    %c0_i32_1 = arith.constant 0 : i32
    return %c0_i32, %c0_i32_0 : i32, i32
  }
  func.func @transform_5(%arg0: i32, %arg1: i32) -> (i32, i32) {
    %c0_i32 = arith.constant 0 : i32
    %c0_i32_0 = arith.constant 0 : i32
    return %arg0, %c0_i32 : i32, i32
  }
}

module attributes {stable_mosaic.version = 11 : i64} {
  func.func @_mlp_kernel(%arg0: i32, %arg1: i32, %arg2: memref<16x128xbf16, #tpu.memory_space<vmem>>, %arg3: memref<128x128xbf16, #tpu.memory_space<vmem>>, %arg4: memref<1x128xf32, #tpu.memory_space<vmem>>, %arg5: memref<128x128xbf16, #tpu.memory_space<vmem>>, %arg6: memref<1x128xf32, #tpu.memory_space<vmem>>, %arg7: memref<16x128xf32, #tpu.memory_space<vmem>>, %arg8: memref<16x128xf32, #tpu.memory_space<vmem>>) attributes {dimension_semantics = [#tpu.dimension_semantics<parallel>, #tpu.dimension_semantics<arbitrary>], iteration_bounds = array<i64: 1, 1>, scalar_prefetch = 0 : i64, scratch_operands = 1 : i64, tpu.core_type = #tpu.core_type<tc>, window_params = [{transform_indices = @transform_0, window_bounds = array<i64: 16, 128>}, {transform_indices = @transform_1, window_bounds = array<i64: 128, 128>}, {transform_indices = @transform_2, window_bounds = array<i64: 1, 128>}, {transform_indices = @transform_3, window_bounds = array<i64: 128, 128>}, {pipeline_mode = #tpu.pipeline_mode<synchronous>, transform_indices = @transform_4, window_bounds = array<i64: 1, 128>}, {transform_indices = @transform_5, window_bounds = array<i64: 16, 128>}]} {
    %c0_i32 = arith.constant 0 : i32
    %0 = arith.cmpi eq, %arg1, %c0_i32 : i32
    %1 = arith.extui %0 : i1 to i32
    %c0_i32_0 = arith.constant 0 : i32
    %2 = arith.cmpi ne, %1, %c0_i32_0 : i32
    scf.if %2 {
      %cst_18 = arith.constant 0.000000e+00 : f32
      %26 = vector.broadcast %cst_18 : f32 to vector<16x128xf32>
      %c0_19 = arith.constant 0 : index
      %c0_20 = arith.constant 0 : index
      %27 = vector.load %arg8[%c0_19, %c0_20] : memref<16x128xf32, #tpu.memory_space<vmem>>, vector<16x128xf32>
      tpu.vector_store %arg8[%c0_19, %c0_20], %26 {strides = array<i32>} : memref<16x128xf32, #tpu.memory_space<vmem>>, vector<16x128xf32>,
    } else {
    }
    %c0 = arith.constant 0 : index
    %c0_1 = arith.constant 0 : index
    %3 = vector.load %arg2[%c0, %c0_1] : memref<16x128xbf16, #tpu.memory_space<vmem>>, vector<16x128xbf16>
    %c0_2 = arith.constant 0 : index
    %c0_3 = arith.constant 0 : index
    %4 = vector.load %arg3[%c0_2, %c0_3] : memref<128x128xbf16, #tpu.memory_space<vmem>>, vector<128x128xbf16>
    %cst = arith.constant dense<0.000000e+00> : vector<16x128xf32>
    %5 = tpu.matmul %3, %4, %cst {dimension_numbers = #tpu.dot_dimension_numbers<[1], [0], [0], [1], [0, 0, 1, 1], [], []>} : vector<16x128xbf16>, vector<128x128xbf16>, vector<16x128xf32> -> vector<16x128xf32>
    %c0_4 = arith.constant 0 : index
    %c0_5 = arith.constant 0 : index
    %6 = vector.load %arg4[%c0_4, %c0_5] : memref<1x128xf32, #tpu.memory_space<vmem>>, vector<1x128xf32>
    %7 = vector.broadcast %6 : vector<1x128xf32> to vector<16x128xf32>
    %8 = arith.addf %5, %7 : vector<16x128xf32>
    %cst_6 = arith.constant 5.000000e-01 : f32
    %9 = vector.broadcast %cst_6 : f32 to vector<16x128xf32>
    %10 = arith.mulf %9, %8 : vector<16x128xf32>
    %cst_7 = arith.constant 0.707106769 : f32
    %11 = vector.broadcast %cst_7 : f32 to vector<16x128xf32>
    %12 = arith.mulf %8, %11 : vector<16x128xf32>
    %13 = math.erf %12 : vector<16x128xf32>
    %cst_8 = arith.constant 1.000000e+00 : f32
    %14 = vector.broadcast %cst_8 : f32 to vector<16x128xf32>
    %15 = arith.addf %14, %13 : vector<16x128xf32>
    %16 = arith.mulf %10, %15 : vector<16x128xf32>
    %c0_9 = arith.constant 0 : index
    %c0_10 = arith.constant 0 : index
    %17 = vector.load %arg8[%c0_9, %c0_10] : memref<16x128xf32, #tpu.memory_space<vmem>>, vector<16x128xf32>
    %18 = arith.truncf %16 : vector<16x128xf32> to vector<16x128xbf16>
    %c0_11 = arith.constant 0 : index
    %c0_12 = arith.constant 0 : index
    %19 = vector.load %arg5[%c0_11, %c0_12] : memref<128x128xbf16, #tpu.memory_space<vmem>>, vector<128x128xbf16>
    %cst_13 = arith.constant dense<0.000000e+00> : vector<16x128xf32>
    %20 = tpu.matmul %18, %19, %cst_13 {dimension_numbers = #tpu.dot_dimension_numbers<[1], [0], [0], [1], [0, 0, 1, 1], [], []>} : vector<16x128xbf16>, vector<128x128xbf16>, vector<16x128xf32> -> vector<16x128xf32>
    %21 = arith.addf %17, %20 : vector<16x128xf32>
    %c0_14 = arith.constant 0 : index
    %c0_15 = arith.constant 0 : index
    %22 = vector.load %arg8[%c0_14, %c0_15] : memref<16x128xf32, #tpu.memory_space<vmem>>, vector<16x128xf32>
    tpu.vector_store %arg8[%c0_14, %c0_15], %21 {strides = array<i32>} : memref<16x128xf32, #tpu.memory_space<vmem>>, vector<16x128xf32>,
    %c0_i32_16 = arith.constant 0 : i32
    %23 = arith.cmpi eq, %arg1, %c0_i32_16 : i32
    %24 = arith.extui %23 : i1 to i32
    %c0_i32_17 = arith.constant 0 : i32
    %25 = arith.cmpi ne, %24, %c0_i32_17 : i32
    scf.if %25 {
      %c0_18 = arith.constant 0 : index
      %c0_19 = arith.constant 0 : index
      %26 = vector.load %arg8[%c0_18, %c0_19] : memref<16x128xf32, #tpu.memory_space<vmem>>, vector<16x128xf32>
      %c0_20 = arith.constant 0 : index
      %c0_21 = arith.constant 0 : index
      %27 = vector.load %arg6[%c0_20, %c0_21] : memref<1x128xf32, #tpu.memory_space<vmem>>, vector<1x128xf32>
      %28 = vector.broadcast %27 : vector<1x128xf32> to vector<16x128xf32>
      %29 = arith.addf %26, %28 : vector<16x128xf32>
      %c0_22 = arith.constant 0 : index
      %c0_23 = arith.constant 0 : index
      %30 = vector.load %arg7[%c0_22, %c0_23] : memref<16x128xf32, #tpu.memory_space<vmem>>, vector<16x128xf32>
      tpu.vector_store %arg7[%c0_22, %c0_23], %29 {strides = array<i32>} : memref<16x128xf32, #tpu.memory_space<vmem>>, vector<16x128xf32>,
    } else {
    }
    return
  }
  func.func @transform_0(%arg0: i32, %arg1: i32) -> (i32, i32) {
    %c0_i32 = arith.constant 0 : i32
    %c0_i32_0 = arith.constant 0 : i32
    return %arg0, %c0_i32 : i32, i32
  }
  func.func @transform_1(%arg0: i32, %arg1: i32) -> (i32, i32) {
    %c0_i32 = arith.constant 0 : i32
    %c0_i32_0 = arith.constant 0 : i32
    return %c0_i32, %arg1 : i32, i32
  }
  func.func @transform_2(%arg0: i32, %arg1: i32) -> (i32, i32) {
    %c0_i32 = arith.constant 0 : i32
    %c0_i32_0 = arith.constant 0 : i32
    return %c0_i32, %arg1 : i32, i32
  }
  func.func @transform_3(%arg0: i32, %arg1: i32) -> (i32, i32) {
    %c0_i32 = arith.constant 0 : i32
    %c0_i32_0 = arith.constant 0 : i32
    return %arg1, %c0_i32 : i32, i32
  }
  func.func @transform_4(%arg0: i32, %arg1: i32) -> (i32, i32) {
    %c0_i32 = arith.constant 0 : i32
    %c0_i32_0 = arith.constant 0 : i32
    %c0_i32_1 = arith.constant 0 : i32
    return %c0_i32, %c0_i32_0 : i32, i32
  }
  func.func @transform_5(%arg0: i32, %arg1: i32) -> (i32, i32) {
    %c0_i32 = arith.constant 0 : i32
    %c0_i32_0 = arith.constant 0 : i32
    return %arg0, %c0_i32 : i32, i32
  }
}

</mosaic_0001>

<bundles_post_ra>
// kernel: tpu_custom_call.1
= control target key start
LH: loop header
LB: loop body
LE: loop exit
PB: predicated region body
PF: predicated region fallthrough
CT: control target
= control target key end

     0   :  { %10 = vsyncpa [#allocation4], 0  ;;  %s597_s0 = inlined_call_operand.hbm [shape: bf16[16,128], index: 0, kind: input, shape index: {}]   ;;  %s598_s1 = inlined_call_operand.hbm [shape: bf16[128,128], index: 1, kind: input, shape index: {}]   ;;  %s599_s2 = inlined_call_operand.vmem [shape: f32[1,128], index: 2, kind: input, shape index: {}]   ;;  %s600_s3 = inlined_call_operand.hbm [shape: bf16[128,128], index: 3, kind: input, shape index: {}]   ;;  %s601_s4 = inlined_call_operand.vmem [shape: f32[1,128], index: 4, kind: input, shape index: {}]   ;;  %s602_s5 = inlined_call_operand.hbm [shape: f32[16,128], index: 5, kind: output, shape index: {}]  }
   0x1   :  { %11 = vsyncpa [#allocation7], 0 }
   0x2   :  { %12 = vsyncpa [#allocation5], 0  ;;  %s539_s18 = smov [#allocation6]   ;;  %s540_s20 = smov [#allocation3]  }
   0x3   :  { %s30_s19 = sshll.u32 %s539_s18, 4  ;;  %s18_s21 = sshll.u32 %s540_s20, 4  ;;  %s31_s19 = int_to_ptr.vmem [resolvable:$true] %s30_s19  ;;  %s19_s21 = int_to_ptr.vmem [resolvable:$true] %s18_s21 }
   0x4   :  { %s461_s22 = scalar_lea.vmem %s31_s19, 1024  ;;  %p466_p1 = scmp.lt.s32.totalorder %s31_s19, %s31_s19 }
   0x5   :  { %p462_p0 = scmp.ne.s32.totalorder %s31_s19, %s461_s22  ;;  %p467_p2 = scmp.lt.s32.totalorder %s461_s22, %s461_s22 }
   0x7   :  { %p468_p3 = por %p467_p2, %p466_p1 }
   0x9   :  { %p469_p4 = pnand %p468_p3, %p462_p0 }
   0xb   :  { %472 = shalt.err (!%p469_p4)
}
   0xc   :  { %s541_s23 = smov 64   ;;  %s542_s24 = smov 4  }
   0xd   :  { %36 = dma.hbm_to_vmem [thread:$0]  %s598_s1, 1024, %s31_s19, [#allocation7], %s541_s23, %s541_s23, %s542_s24  }
   0xe   :  { %s481_s27 = scalar_lea.vmem %s19_s21, 128  ;;  %p486_p6 = scmp.lt.s32.totalorder %s19_s21, %s19_s21 }
   0xf   :  { %p482_p5 = scmp.ne.s32.totalorder %s19_s21, %s481_s27  ;;  %p487_p7 = scmp.lt.s32.totalorder %s481_s27, %s481_s27 }
  0x11   :  { %p488_p8 = por %p487_p7, %p486_p6 }
  0x13   :  { %p489_p9 = pnand %p488_p8, %p482_p5 }
  0x15   :  { %492 = shalt.err (!%p489_p9)
}
  0x16   :  { %24 = dma.hbm_to_vmem [thread:$0]  %s597_s0, 128, %s19_s21, [#allocation4], %s541_s23, %s541_s23, %s542_s24  }
  0x17   :  { %s543_s30 = smov [#allocation8]  }
  0x18   :  { %s44_s6 = sshll.u32 %s543_s30, 4  ;;  %s45_s6 = int_to_ptr.vmem [resolvable:$true] %s44_s6 }
  0x19   :  { %s501_s7 = scalar_lea.vmem %s45_s6, 1024  ;;  %p506_p11 = scmp.lt.s32.totalorder %s45_s6, %s45_s6 }
  0x1a   :  { %p502_p10 = scmp.ne.s32.totalorder %s45_s6, %s501_s7  ;;  %p507_p12 = scmp.lt.s32.totalorder %s501_s7, %s501_s7 }
  0x1c   :  { %p508_p13 = por %p507_p12, %p506_p11 }
  0x1e   :  { %p509_p0 = pnand %p508_p13, %p502_p10 }
  0x20   :  { %512 = shalt.err (!%p509_p0)
}
  0x21   :  { %50 = dma.hbm_to_vmem [thread:$0]  %s600_s3, 1024, %s45_s6, [#allocation7], %s541_s23, %s541_s23, %s542_s24  }
  0x22   :  { %533 = dma.done.wait [#allocation4], 128  }
  0x23   :  { %534 = vsyncadd [#allocation4], 4294967168 }
  0x24   :  { %535 = dma.done.wait [#allocation7], 2048  }
  0x25   :  { %536 = vsyncadd [#allocation7], 4294965248  ;;  %v544_v0 = vmov 0.0   ;;  %vm545_vm0 = vmmov 0   ;;  %v432_v1 = vld [vmem:[#allocation6 + $0x38] sm:$0xff]   ;;  %v433_v2 = vld [vmem:[#allocation6 + $0x30] sm:$0xff]  }
  0x26   :  { %382 = vmatprep.subr.bf16.mxu0 %v544_v0  ;;  %398 = vmatprep.mubr.msk.bf16.mxu0 %vm545_vm0, %v544_v0  ;;  %v434_v3 = vld [vmem:[#allocation6 + $0x28] sm:$0xff]   ;;  %v441_v4 = vld [vmem:[#allocation8 + $0x38] sm:$0xff]   ;;  %v435_v5 = vld [vmem:[#allocation6 + $0x20] sm:$0xff]   ;;  %s546_s10 = smov [#allocation9]  }
  0x27   :  { %402 = vmatprep.subr.bf16.mxu1 %v544_v0  ;;  %418 = vmatprep.mubr.msk.bf16.mxu1 %vm545_vm0, %v544_v0  ;;  %v436_v6 = vld [vmem:[#allocation6 + $0x18] sm:$0xff]   ;;  %v437_v7 = vld [vmem:[#allocation6 + $0x10] sm:$0xff]   ;;  %v438_v8 = vld [vmem:[#allocation6 + $0x8] sm:$0xff]   ;;  %s332_s11 = sshll.u32 %s546_s10, 4  ;;  %s333_s11 = int_to_ptr.vmem [resolvable:$true] %s332_s11 }
  0x28   :  { %383 = vmatpush3.bf16.msra.mxu0 %v432_v1  ;;  %403 = vmatpush3.bf16.msra.mxu1 %v441_v4  ;;  %v439_v9 = vld [vmem:[#allocation6] sm:$0xff]   ;;  %v440_v10 = vld [vmem:[#allocation3] sm:$0xff]   ;;  %v442_v11 = vld [vmem:[#allocation8 + $0x30] sm:$0xff]   ;;  %s513_s12 = scalar_lea.vmem %s333_s11, 256  ;;  %p518_p2 = scmp.lt.s32.totalorder %s333_s11, %s333_s11 }
  0x29   :  { %384 = vmatprep.subr.bf16.mxu0 %v544_v0  ;;  %404 = vmatprep.subr.bf16.mxu1 %v544_v0  ;;  %v443_v12 = vld [vmem:[#allocation8 + $0x28] sm:$0xff]   ;;  %v444_v13 = vld [vmem:[#allocation8 + $0x20] sm:$0xff]   ;;  %v445_v14 = vld [vmem:[#allocation8 + $0x18] sm:$0xff]   ;;  %p514_p1 = scmp.ne.s32.totalorder %s333_s11, %s513_s12  ;;  %p519_p3 = scmp.lt.s32.totalorder %s513_s12, %s513_s12 }
  0x2a   :  { %v446_v15 = vld [vmem:[#allocation8 + $0x10] sm:$0xff]   ;;  %v447_v16 = vld [vmem:[#allocation8 + $0x8] sm:$0xff]   ;;  %v448_v17 = vld [vmem:[#allocation8] sm:$0xff]  }
  0x2b   :  { %v345_v18 = vld [vmem:[%s599_s2] ss:$0 sm:$0xff]  ;;  %p520_p4 = por %p519_p3, %p518_p2 }
  0x2c   :  { %385 = vmatpush3.bf16.msra.mxu0 %v433_v2  ;;  %405 = vmatpush3.bf16.msra.mxu1 %v442_v11  ;;  %v363_v36 = vld [vmem:[%s601_s4] ss:$0 sm:$0xff] }
  0x2d   :  { %386 = vmatprep.subr.bf16.mxu0 %v544_v0  ;;  %406 = vmatprep.subr.bf16.mxu1 %v544_v0  ;;  %p521_p5 = pnand %p520_p4, %p514_p1 }
  0x30   :  { %387 = vmatpush3.bf16.msra.mxu0 %v434_v3  ;;  %407 = vmatpush3.bf16.msra.mxu1 %v443_v12 }
  0x31   :  { %388 = vmatprep.subr.bf16.mxu0 %v544_v0  ;;  %408 = vmatprep.subr.bf16.mxu1 %v544_v0 }
  0x34   :  { %389 = vmatpush3.bf16.msra.mxu0 %v435_v5  ;;  %409 = vmatpush3.bf16.msra.mxu1 %v444_v13 }
  0x35   :  { %390 = vmatprep.subr.bf16.mxu0 %v544_v0  ;;  %410 = vmatprep.subr.bf16.mxu1 %v544_v0 }
  0x38   :  { %391 = vmatpush3.bf16.msra.mxu0 %v436_v6  ;;  %411 = vmatpush3.bf16.msra.mxu1 %v445_v14 }
  0x39   :  { %392 = vmatprep.subr.bf16.mxu0 %v544_v0  ;;  %412 = vmatprep.subr.bf16.mxu1 %v544_v0 }
  0x3c   :  { %393 = vmatpush3.bf16.msra.mxu0 %v437_v7  ;;  %413 = vmatpush3.bf16.msra.mxu1 %v446_v15 }
  0x3d   :  { %394 = vmatprep.subr.bf16.mxu0 %v544_v0  ;;  %414 = vmatprep.subr.bf16.mxu1 %v544_v0 }
  0x40   :  { %395 = vmatpush3.bf16.msra.mxu0 %v438_v8  ;;  %415 = vmatpush3.bf16.msra.mxu1 %v447_v16 }
  0x41   :  { %396 = vmatprep.subr.bf16.mxu0 %v544_v0  ;;  %416 = vmatprep.subr.bf16.mxu1 %v544_v0 }
  0x44   :  { %397 = vmatpush3.bf16.msra.mxu0 %v439_v9  ;;  %417 = vmatpush3.bf16.msra.mxu1 %v448_v17 }
  0x47   :  { %399 = vmatmul.mubr.bf16.vlgmr.msra.gmra.mxu0 %v440_v10 }
 0x107   :  { %v182_v19 = vpop.f32.mrf.mxu0 }
 0x108   :  { %v183_v20 = vadd.f32 %v345_v18, %v182_v19 }
 0x109   :  { %v400_v21 = vpop.f32.mrf.mxu0 }
 0x10a   :  { %v191_v22 = vmul.f32 0.70710677, %v183_v20  ;;  %v189_v30 = vmul.f32 0.5, %v183_v20 }
 0x10b   :  { %v185_v23 = vpop.f32.mrf.mxu0 }
 0x10c   :  { %449 = verf.f32 %v191_v22  ;;  %v186_v24 = vadd.f32 %v345_v18, %v185_v23 }
 0x10d   :  { %v401_v25 = vpop.f32.mrf.mxu0 }
 0x10e   :  { %v192_v26 = vmul.f32 0.70710677, %v186_v24  ;;  %v190_v31 = vmul.f32 0.5, %v186_v24 }
 0x110   :  { %451 = verf.f32 %v192_v26 }
 0x119   :  { %v450_v27 = vpop.eup %449 }
 0x11a   :  { %v195_v28 = vadd.f32 1.0, %v450_v27 }
 0x11c   :  { %v197_v33 = vmul.f32 %v195_v28, %v189_v30 }
 0x11d   :  { %v452_v29 = vpop.eup %451 }
 0x11e   :  { %v196_v32 = vadd.f32 1.0, %v452_v29 }
 0x120   :  { %v198_v34 = vmul.f32 %v196_v32, %v190_v31 }
 0x122   :  { %v201_v35 = vpack.c.bf16 %v198_v34, %v197_v33 }
 0x124   :  { %419 = vmatmul.mubr.bf16.vlgmr.msra.gmra.mxu1 %v201_v35 }
 0x1e4   :  { %v300_v37 = vpop.f32.mrf.mxu1 }
 0x1e5   :  { %v323_v38 = vadd.f32 %v363_v36, %v300_v37 }
 0x1e6   :  { %v420_v39 = vpop.f32.mrf.mxu1 }
 0x1e7   :  { %325 = vst [vmem:[#allocation9] sm:$0xff] %v323_v38 }
 0x1e8   :  { %v303_v40 = vpop.f32.mrf.mxu1 }
 0x1e9   :  { %v324_v41 = vadd.f32 %v363_v36, %v303_v40 }
 0x1ea   :  { %v421_v42 = vpop.f32.mrf.mxu1 }
 0x1eb   :  { %326 = vst [vmem:[#allocation9 + $0x8] sm:$0xff] %v324_v41 }
 0x1ec   :  { %524 = shalt.err (!%p521_p5)
}
 0x1ed   :  { %s547_s13 = smov 128   ;;  %s548_s4 = smov 8  }
 0x1ee   :  { %338 = dma.vmem_to_hbm [thread:$0]  %s333_s11, 256, %s602_s5, [#allocation5], %s547_s13, %s547_s13, %s548_s4  }
 0x1ef   :  { %537 = dma.done.wait [#allocation5], 256  }
 0x1f0   :  { %538 = vsyncadd [#allocation5], 4294967040 }
 0x1f1   :  { %342 = vsyncpa [#allocation4], 1 }
 0x1f2   :  { %343 = vsyncpa [#allocation7], 1 }
 0x1f3   :  { %344 = vsyncpa [#allocation5], 1 }

// kernel: tpu_custom_call.1
= control target key start
LH: loop header
LB: loop body
LE: loop exit
PB: predicated region body
PF: predicated region fallthrough
CT: control target
= control target key end

     0   :  { %10 = vsyncpa [#allocation4], 0  ;;  %s597_s0 = inlined_call_operand.hbm [shape: bf16[16,128], index: 0, kind: input, shape index: {}]   ;;  %s598_s1 = inlined_call_operand.hbm [shape: bf16[128,128], index: 1, kind: input, shape index: {}]   ;;  %s599_s2 = inlined_call_operand.vmem [shape: f32[1,128], index: 2, kind: input, shape index: {}]   ;;  %s600_s3 = inlined_call_operand.hbm [shape: bf16[128,128], index: 3, kind: input, shape index: {}]   ;;  %s601_s4 = inlined_call_operand.vmem [shape: f32[1,128], index: 4, kind: input, shape index: {}]   ;;  %s602_s5 = inlined_call_operand.hbm [shape: f32[16,128], index: 5, kind: output, shape index: {}]  }
   0x1   :  { %11 = vsyncpa [#allocation7], 0 }
   0x2   :  { %12 = vsyncpa [#allocation5], 0  ;;  %s539_s18 = smov [#allocation6]   ;;  %s540_s20 = smov [#allocation3]  }
   0x3   :  { %s30_s19 = sshll.u32 %s539_s18, 4  ;;  %s18_s21 = sshll.u32 %s540_s20, 4  ;;  %s31_s19 = int_to_ptr.vmem [resolvable:$true] %s30_s19  ;;  %s19_s21 = int_to_ptr.vmem [resolvable:$true] %s18_s21 }
   0x4   :  { %s461_s22 = scalar_lea.vmem %s31_s19, 1024  ;;  %p466_p1 = scmp.lt.s32.totalorder %s31_s19, %s31_s19 }
   0x5   :  { %p462_p0 = scmp.ne.s32.totalorder %s31_s19, %s461_s22  ;;  %p467_p2 = scmp.lt.s32.totalorder %s461_s22, %s461_s22 }
   0x7   :  { %p468_p3 = por %p467_p2, %p466_p1 }
   0x9   :  { %p469_p4 = pnand %p468_p3, %p462_p0 }
   0xb   :  { %472 = shalt.err (!%p469_p4)
}
   0xc   :  { %s541_s23 = smov 64   ;;  %s542_s24 = smov 4  }
   0xd   :  { %36 = dma.hbm_to_vmem [thread:$0]  %s598_s1, 1024, %s31_s19, [#allocation7], %s541_s23, %s541_s23, %s542_s24  }
   0xe   :  { %s481_s27 = scalar_lea.vmem %s19_s21, 128  ;;  %p486_p6 = scmp.lt.s32.totalorder %s19_s21, %s19_s21 }
   0xf   :  { %p482_p5 = scmp.ne.s32.totalorder %s19_s21, %s481_s27  ;;  %p487_p7 = scmp.lt.s32.totalorder %s481_s27, %s481_s27 }
  0x11   :  { %p488_p8 = por %p487_p7, %p486_p6 }
  0x13   :  { %p489_p9 = pnand %p488_p8, %p482_p5 }
  0x15   :  { %492 = shalt.err (!%p489_p9)
}
  0x16   :  { %24 = dma.hbm_to_vmem [thread:$0]  %s597_s0, 128, %s19_s21, [#allocation4], %s541_s23, %s541_s23, %s542_s24  }
  0x17   :  { %s543_s30 = smov [#allocation8]  }
  0x18   :  { %s44_s6 = sshll.u32 %s543_s30, 4  ;;  %s45_s6 = int_to_ptr.vmem [resolvable:$true] %s44_s6 }
  0x19   :  { %s501_s7 = scalar_lea.vmem %s45_s6, 1024  ;;  %p506_p11 = scmp.lt.s32.totalorder %s45_s6, %s45_s6 }
  0x1a   :  { %p502_p10 = scmp.ne.s32.totalorder %s45_s6, %s501_s7  ;;  %p507_p12 = scmp.lt.s32.totalorder %s501_s7, %s501_s7 }
  0x1c   :  { %p508_p13 = por %p507_p12, %p506_p11 }
  0x1e   :  { %p509_p0 = pnand %p508_p13, %p502_p10 }
  0x20   :  { %512 = shalt.err (!%p509_p0)
}
  0x21   :  { %50 = dma.hbm_to_vmem [thread:$0]  %s600_s3, 1024, %s45_s6, [#allocation7], %s541_s23, %s541_s23, %s542_s24  }
  0x22   :  { %533 = dma.done.wait [#allocation4], 128  }
  0x23   :  { %534 = vsyncadd [#allocation4], 4294967168 }
  0x24   :  { %535 = dma.done.wait [#allocation7], 2048  }
  0x25   :  { %536 = vsyncadd [#allocation7], 4294965248  ;;  %v544_v0 = vmov 0.0   ;;  %vm545_vm0 = vmmov 0   ;;  %v432_v1 = vld [vmem:[#allocation6 + $0x38] sm:$0xff]   ;;  %v433_v2 = vld [vmem:[#allocation6 + $0x30] sm:$0xff]  }
  0x26   :  { %382 = vmatprep.subr.bf16.mxu0 %v544_v0  ;;  %398 = vmatprep.mubr.msk.bf16.mxu0 %vm545_vm0, %v544_v0  ;;  %v434_v3 = vld [vmem:[#allocation6 + $0x28] sm:$0xff]   ;;  %v441_v4 = vld [vmem:[#allocation8 + $0x38] sm:$0xff]   ;;  %v435_v5 = vld [vmem:[#allocation6 + $0x20] sm:$0xff]   ;;  %s546_s10 = smov [#allocation9]  }
  0x27   :  { %402 = vmatprep.subr.bf16.mxu1 %v544_v0  ;;  %418 = vmatprep.mubr.msk.bf16.mxu1 %vm545_vm0, %v544_v0  ;;  %v436_v6 = vld [vmem:[#allocation6 + $0x18] sm:$0xff]   ;;  %v437_v7 = vld [vmem:[#allocation6 + $0x10] sm:$0xff]   ;;  %v438_v8 = vld [vmem:[#allocation6 + $0x8] sm:$0xff]   ;;  %s332_s11 = sshll.u32 %s546_s10, 4  ;;  %s333_s11 = int_to_ptr.vmem [resolvable:$true] %s332_s11 }
  0x28   :  { %383 = vmatpush3.bf16.msra.mxu0 %v432_v1  ;;  %403 = vmatpush3.bf16.msra.mxu1 %v441_v4  ;;  %v439_v9 = vld [vmem:[#allocation6] sm:$0xff]   ;;  %v440_v10 = vld [vmem:[#allocation3] sm:$0xff]   ;;  %v442_v11 = vld [vmem:[#allocation8 + $0x30] sm:$0xff]   ;;  %s513_s12 = scalar_lea.vmem %s333_s11, 256  ;;  %p518_p2 = scmp.lt.s32.totalorder %s333_s11, %s333_s11 }
  0x29   :  { %384 = vmatprep.subr.bf16.mxu0 %v544_v0  ;;  %404 = vmatprep.subr.bf16.mxu1 %v544_v0  ;;  %v443_v12 = vld [vmem:[#allocation8 + $0x28] sm:$0xff]   ;;  %v444_v13 = vld [vmem:[#allocation8 + $0x20] sm:$0xff]   ;;  %v445_v14 = vld [vmem:[#allocation8 + $0x18] sm:$0xff]   ;;  %p514_p1 = scmp.ne.s32.totalorder %s333_s11, %s513_s12  ;;  %p519_p3 = scmp.lt.s32.totalorder %s513_s12, %s513_s12 }
  0x2a   :  { %v446_v15 = vld [vmem:[#allocation8 + $0x10] sm:$0xff]   ;;  %v447_v16 = vld [vmem:[#allocation8 + $0x8] sm:$0xff]   ;;  %v448_v17 = vld [vmem:[#allocation8] sm:$0xff]  }
  0x2b   :  { %v345_v18 = vld [vmem:[%s599_s2] ss:$0 sm:$0xff]  ;;  %p520_p4 = por %p519_p3, %p518_p2 }
  0x2c   :  { %385 = vmatpush3.bf16.msra.mxu0 %v433_v2  ;;  %405 = vmatpush3.bf16.msra.mxu1 %v442_v11  ;;  %v363_v36 = vld [vmem:[%s601_s4] ss:$0 sm:$0xff] }
  0x2d   :  { %386 = vmatprep.subr.bf16.mxu0 %v544_v0  ;;  %406 = vmatprep.subr.bf16.mxu1 %v544_v0  ;;  %p521_p5 = pnand %p520_p4, %p514_p1 }
  0x30   :  { %387 = vmatpush3.bf16.msra.mxu0 %v434_v3  ;;  %407 = vmatpush3.bf16.msra.mxu1 %v443_v12 }
  0x31   :  { %388 = vmatprep.subr.bf16.mxu0 %v544_v0  ;;  %408 = vmatprep.subr.bf16.mxu1 %v544_v0 }
  0x34   :  { %389 = vmatpush3.bf16.msra.mxu0 %v435_v5  ;;  %409 = vmatpush3.bf16.msra.mxu1 %v444_v13 }
  0x35   :  { %390 = vmatprep.subr.bf16.mxu0 %v544_v0  ;;  %410 = vmatprep.subr.bf16.mxu1 %v544_v0 }
  0x38   :  { %391 = vmatpush3.bf16.msra.mxu0 %v436_v6  ;;  %411 = vmatpush3.bf16.msra.mxu1 %v445_v14 }
  0x39   :  { %392 = vmatprep.subr.bf16.mxu0 %v544_v0  ;;  %412 = vmatprep.subr.bf16.mxu1 %v544_v0 }
  0x3c   :  { %393 = vmatpush3.bf16.msra.mxu0 %v437_v7  ;;  %413 = vmatpush3.bf16.msra.mxu1 %v446_v15 }
  0x3d   :  { %394 = vmatprep.subr.bf16.mxu0 %v544_v0  ;;  %414 = vmatprep.subr.bf16.mxu1 %v544_v0 }
  0x40   :  { %395 = vmatpush3.bf16.msra.mxu0 %v438_v8  ;;  %415 = vmatpush3.bf16.msra.mxu1 %v447_v16 }
  0x41   :  { %396 = vmatprep.subr.bf16.mxu0 %v544_v0  ;;  %416 = vmatprep.subr.bf16.mxu1 %v544_v0 }
  0x44   :  { %397 = vmatpush3.bf16.msra.mxu0 %v439_v9  ;;  %417 = vmatpush3.bf16.msra.mxu1 %v448_v17 }
  0x47   :  { %399 = vmatmul.mubr.bf16.vlgmr.msra.gmra.mxu0 %v440_v10 }
 0x107   :  { %v182_v19 = vpop.f32.mrf.mxu0 }
 0x108   :  { %v183_v20 = vadd.f32 %v345_v18, %v182_v19 }
 0x109   :  { %v400_v21 = vpop.f32.mrf.mxu0 }
 0x10a   :  { %v191_v22 = vmul.f32 0.70710677, %v183_v20  ;;  %v189_v30 = vmul.f32 0.5, %v183_v20 }
 0x10b   :  { %v185_v23 = vpop.f32.mrf.mxu0 }
 0x10c   :  { %449 = verf.f32 %v191_v22  ;;  %v186_v24 = vadd.f32 %v345_v18, %v185_v23 }
 0x10d   :  { %v401_v25 = vpop.f32.mrf.mxu0 }
 0x10e   :  { %v192_v26 = vmul.f32 0.70710677, %v186_v24  ;;  %v190_v31 = vmul.f32 0.5, %v186_v24 }
 0x110   :  { %451 = verf.f32 %v192_v26 }
 0x119   :  { %v450_v27 = vpop.eup %449 }
 0x11a   :  { %v195_v28 = vadd.f32 1.0, %v450_v27 }
 0x11c   :  { %v197_v33 = vmul.f32 %v195_v28, %v189_v30 }
 0x11d   :  { %v452_v29 = vpop.eup %451 }
 0x11e   :  { %v196_v32 = vadd.f32 1.0, %v452_v29 }
 0x120   :  { %v198_v34 = vmul.f32 %v196_v32, %v190_v31 }
 0x122   :  { %v201_v35 = vpack.c.bf16 %v198_v34, %v197_v33 }
 0x124   :  { %419 = vmatmul.mubr.bf16.vlgmr.msra.gmra.mxu1 %v201_v35 }
 0x1e4   :  { %v300_v37 = vpop.f32.mrf.mxu1 }
 0x1e5   :  { %v323_v38 = vadd.f32 %v363_v36, %v300_v37 }
 0x1e6   :  { %v420_v39 = vpop.f32.mrf.mxu1 }
 0x1e7   :  { %325 = vst [vmem:[#allocation9] sm:$0xff] %v323_v38 }
 0x1e8   :  { %v303_v40 = vpop.f32.mrf.mxu1 }
 0x1e9   :  { %v324_v41 = vadd.f32 %v363_v36, %v303_v40 }
 0x1ea   :  { %v421_v42 = vpop.f32.mrf.mxu1 }
 0x1eb   :  { %326 = vst [vmem:[#allocation9 + $0x8] sm:$0xff] %v324_v41 }
 0x1ec   :  { %524 = shalt.err (!%p521_p5)
}
 0x1ed   :  { %s547_s13 = smov 128   ;;  %s548_s4 = smov 8  }
 0x1ee   :  { %338 = dma.vmem_to_hbm [thread:$0]  %s333_s11, 256, %s602_s5, [#allocation5], %s547_s13, %s547_s13, %s548_s4  }
 0x1ef   :  { %537 = dma.done.wait [#allocation5], 256  }
 0x1f0   :  { %538 = vsyncadd [#allocation5], 4294967040 }
 0x1f1   :  { %342 = vsyncpa [#allocation4], 1 }
 0x1f2   :  { %343 = vsyncpa [#allocation7], 1 }
 0x1f3   :  { %344 = vsyncpa [#allocation5], 1 }

</bundles_post_ra>
